<compile_context>
chip_gen: v5e
topology: v5e:2x2
jax: 0.10.0
libtpu: 0.0.40
codegen_flags: <defaults>
</compile_context>

<pallas_src>
import functools

import jax
import jax.numpy as jnp
from jax import lax
from jax.experimental import pallas as pl
from jax.experimental.pallas import tpu as pltpu


def _dense_dirichlet_kernel(x_ref, w_ref, b_ref, o_ref, *, evidence):
    # x_ref: (TB, F)   current batch tile (pipelined)
    # w_ref: (U, F)    full weight in nn.Linear layout (resident across grid)
    # b_ref: (1, U)    bias (resident across grid)
    # o_ref: (TB, 2U)  output tile; [:, :U] = alpha, [:, U:] = prob
    x = x_ref[...]
    w = w_ref[...]
    b = b_ref[...]
    u = w.shape[0]

    # Linear: x @ W^T + b.  Contract x axis 1 with W axis 1 directly (no
    # wrapper-side transpose); MXU accumulates in f32.
    out = lax.dot_general(
        x, w,
        dimension_numbers=(((1,), (1,)), ((), ())),
        preferred_element_type=jnp.float32,
    ) + b

    if evidence == "exp":
        ev = jnp.exp(jnp.clip(out, -10.0, 10.0))      # EUP exp
    elif evidence == "softplus":
        ev = jax.nn.softplus(out)
    elif evidence == "relu":
        ev = jnp.maximum(out, 0.0)
    else:
        raise ValueError(f"unknown evidence mode: {evidence}")

    alpha = ev + 1.0

    # prob = alpha / sum(alpha, axis=1, keepdims=True)
    denom = jnp.sum(alpha, axis=1, keepdims=True)
    prob = alpha / denom

    # Two direct slab stores — no concatenate / relayout.
    o_ref[:, :u] = alpha.astype(o_ref.dtype)
    o_ref[:, u:] = prob.astype(o_ref.dtype)


@functools.partial(jax.jit, static_argnames=("evidence", "block_b"))
def dense_dirichlet(x, weight, bias, *, evidence="exp", block_b=256):
    """x: (B, F) f32; weight: (U, F) f32; bias: (U,) f32 -> (B, 2*U) f32."""
    B, F = x.shape
    U = weight.shape[0]
    b2 = bias.reshape(1, U)  # 2D for in-kernel broadcasting

    # Tile the batch axis.  If the whole batch fits in one tile, use it as-is
    # (block == full dim satisfies the (8,128) rule); otherwise pad B up to a
    # multiple of the tile so the grid divides evenly.
    if B <= block_b:
        TB, Bp = B, B
        x_p = x
    else:
        TB = block_b  # multiple of 8
        Bp = pl.cdiv(B, TB) * TB
        x_p = jnp.pad(x, ((0, Bp - B), (0, 0)))  # padded rows sliced off below

    kernel = functools.partial(_dense_dirichlet_kernel, evidence=evidence)

    out = pl.pallas_call(
        kernel,
        out_shape=jax.ShapeDtypeStruct((Bp, 2 * U), jnp.float32),
        grid_spec=pltpu.PrefetchScalarGridSpec(
            num_scalar_prefetch=0,
            grid=(Bp // TB,),
            in_specs=[
                pl.BlockSpec((TB, F), lambda i: (i, 0)),   # batch tile (pipelined)
                pl.BlockSpec((U, F), lambda i: (0, 0)),    # weight (resident)
                pl.BlockSpec((1, U), lambda i: (0, 0)),    # bias (resident)
            ],
            out_specs=pl.BlockSpec((TB, 2 * U), lambda i: (i, 0)),
        ),
        compiler_params=pltpu.CompilerParams(
            dimension_semantics=("parallel",),        # batch is embarrassingly parallel
            vmem_limit_bytes=32 * 1024 * 1024,        # safe on v5e/v6e/v7x
        ),
    )(x_p, weight, b2)

    if Bp != B:
        out = out[:B]
    return out


def dense_dirichlet_ref(x, weight, bias, evidence="exp"):
    out = x @ weight.T + bias
    if evidence == "exp":
        ev = jnp.exp(jnp.clip(out, -10.0, 10.0))
    elif evidence == "softplus":
        ev = jax.nn.softplus(out)
    else:  # relu
        ev = jnp.maximum(out, 0.0)
    alpha = ev + 1.0
    prob = alpha / jnp.sum(alpha, axis=1, keepdims=True)
    return jnp.concatenate([alpha, prob], axis=-1)


if __name__ == "__main__":
    key = jax.random.PRNGKey(0)
    k_x, k_w, k_b = jax.random.split(key, 3)

    batch, in_features, units = 8, 32, 16

    x = jax.random.normal(k_x, (batch, in_features), dtype=jnp.float32)

    # Deterministic nn.Linear-style init: U(-1/sqrt(F), 1/sqrt(F))
    bound = 1.0 / jnp.sqrt(jnp.float32(in_features))
    weight = jax.random.uniform(
        k_w, (units, in_features), minval=-bound, maxval=bound, dtype=jnp.float32
    )
    bias = jax.random.uniform(
        k_b, (units,), minval=-bound, maxval=bound, dtype=jnp.float32
    )

    # Default 'exp' evidence path.
    out = dense_dirichlet(x, weight, bias)
    jax.block_until_ready(out)
    ref = dense_dirichlet_ref(x, weight, bias)
    assert out.shape == (batch, 2 * units)
    assert jnp.allclose(out, ref, atol=1e-4, rtol=1e-4), "exp path mismatch"

    # Alternate evidence branches from the module.
    for mode in ("softplus", "relu"):
        out_m = dense_dirichlet(x, weight, bias, evidence=mode)
        jax.block_until_ready(out_m)
        ref_m = dense_dirichlet_ref(x, weight, bias, evidence=mode)
        assert jnp.allclose(out_m, ref_m, atol=1e-4, rtol=1e-4), f"{mode} mismatch"

    # Tiled (B > block_b) path with a batch that is not a multiple of the tile.
    big_b = 300
    xb = jax.random.normal(key, (big_b, in_features), dtype=jnp.float32)
    out_b = dense_dirichlet(xb, weight, bias, block_b=256)
    jax.block_until_ready(out_b)
    ref_b = dense_dirichlet_ref(xb, weight, bias)
    assert out_b.shape == (big_b, 2 * units)
    assert jnp.allclose(out_b, ref_b, atol=1e-4, rtol=1e-4), "tiled path mismatch"

    print("KERNEL_OK")
</pallas_src>

<mosaic_0001>
module attributes {stable_mosaic.version = 11 : i64} {
  func.func @_dense_dirichlet_kernel(%arg0: i32, %arg1: memref<8x32xf32, #tpu.memory_space<vmem>>, %arg2: memref<16x32xf32, #tpu.memory_space<vmem>>, %arg3: memref<1x16xf32, #tpu.memory_space<vmem>>, %arg4: memref<8x32xf32, #tpu.memory_space<vmem>>) attributes {dimension_semantics = [#tpu.dimension_semantics<parallel>], iteration_bounds = array<i64: 1>, scalar_prefetch = 0 : i64, scratch_operands = 0 : i64, tpu.core_type = #tpu.core_type<tc>, window_params = [{transform_indices = @transform_0, window_bounds = array<i64: 8, 32>}, {pipeline_mode = #tpu.pipeline_mode<synchronous>, transform_indices = @transform_1, window_bounds = array<i64: 16, 32>}, {pipeline_mode = #tpu.pipeline_mode<synchronous>, transform_indices = @transform_2, window_bounds = array<i64: 1, 16>}, {transform_indices = @transform_3, window_bounds = array<i64: 8, 32>}]} {
    %c0 = arith.constant 0 : index
    %c0_0 = arith.constant 0 : index
    %0 = vector.load %arg1[%c0, %c0_0] : memref<8x32xf32, #tpu.memory_space<vmem>>, vector<8x32xf32>
    %c0_1 = arith.constant 0 : index
    %c0_2 = arith.constant 0 : index
    %1 = vector.load %arg2[%c0_1, %c0_2] : memref<16x32xf32, #tpu.memory_space<vmem>>, vector<16x32xf32>
    %c0_3 = arith.constant 0 : index
    %c0_4 = arith.constant 0 : index
    %2 = vector.load %arg3[%c0_3, %c0_4] : memref<1x16xf32, #tpu.memory_space<vmem>>, vector<1x16xf32>
    %cst = arith.constant dense<0.000000e+00> : vector<8x16xf32>
    %3 = tpu.matmul %0, %1, %cst {dimension_numbers = #tpu.dot_dimension_numbers<[1], [1], [0], [0], [0, 0, 1, 0], [], []>} : vector<8x32xf32>, vector<16x32xf32>, vector<8x16xf32> -> vector<8x16xf32>
    %4 = vector.broadcast %2 : vector<1x16xf32> to vector<8x16xf32>
    %5 = arith.addf %3, %4 : vector<8x16xf32>
    %cst_5 = arith.constant -1.000000e+01 : f32
    %cst_6 = arith.constant 1.000000e+01 : f32
    %6 = vector.broadcast %cst_5 : f32 to vector<8x16xf32>
    %7 = arith.maximumf %6, %5 : vector<8x16xf32>
    %8 = vector.broadcast %cst_6 : f32 to vector<8x16xf32>
    %9 = arith.minimumf %8, %7 : vector<8x16xf32>
    %10 = math.exp %9 : vector<8x16xf32>
    %cst_7 = arith.constant 1.000000e+00 : f32
    %11 = vector.broadcast %cst_7 : f32 to vector<8x16xf32>
    %12 = arith.addf %10, %11 : vector<8x16xf32>
    %cst_8 = arith.constant dense<0.000000e+00> : vector<8xf32>
    %13 = vector.multi_reduction <add>, %12, %cst_8 [1] : vector<8x16xf32> to vector<8xf32>
    %14 = vector.shape_cast %13 : vector<8xf32> to vector<8x1xf32>
    %15 = vector.broadcast %14 : vector<8x1xf32> to vector<8x16xf32>
    %16 = arith.divf %12, %15 : vector<8x16xf32>
    %c0_9 = arith.constant 0 : index
    %c0_10 = arith.constant 0 : index
    %17 = vector.load %arg4[%c0_9, %c0_10] : memref<8x32xf32, #tpu.memory_space<vmem>>, vector<8x16xf32>
    tpu.vector_store %arg4[%c0_9, %c0_10], %12 {strides = array<i32>} : memref<8x32xf32, #tpu.memory_space<vmem>>, vector<8x16xf32>,
    %c0_11 = arith.constant 0 : index
    %c16 = arith.constant 16 : index
    %18 = vector.load %arg4[%c0_11, %c16] : memref<8x32xf32, #tpu.memory_space<vmem>>, vector<8x16xf32>
    tpu.vector_store %arg4[%c0_11, %c16], %16 {strides = array<i32>} : memref<8x32xf32, #tpu.memory_space<vmem>>, vector<8x16xf32>,
    return
  }
  func.func @transform_0(%arg0: i32) -> (i32, i32) {
    %c0_i32 = arith.constant 0 : i32
    %c0_i32_0 = arith.constant 0 : i32
    return %arg0, %c0_i32 : i32, i32
  }
  func.func @transform_1(%arg0: i32) -> (i32, i32) {
    %c0_i32 = arith.constant 0 : i32
    %c0_i32_0 = arith.constant 0 : i32
    %c0_i32_1 = arith.constant 0 : i32
    return %c0_i32, %c0_i32_0 : i32, i32
  }
  func.func @transform_2(%arg0: i32) -> (i32, i32) {
    %c0_i32 = arith.constant 0 : i32
    %c0_i32_0 = arith.constant 0 : i32
    %c0_i32_1 = arith.constant 0 : i32
    return %c0_i32, %c0_i32_0 : i32, i32
  }
  func.func @transform_3(%arg0: i32) -> (i32, i32) {
    %c0_i32 = arith.constant 0 : i32
    %c0_i32_0 = arith.constant 0 : i32
    return %arg0, %c0_i32 : i32, i32
  }
}

</mosaic_0001>

<bundles_post_ra>
// kernel: dense_dirichlet.1
= control target key start
LH: loop header
LB: loop body
LE: loop exit
PB: predicated region body
PF: predicated region fallthrough
CT: control target
= control target key end

     0   :  { %8 = vsyncpa [#allocation3], 0  ;;  %s262_s0 = inlined_call_operand.hbm [shape: f32[8,32], index: 0, kind: input, shape index: {}]   ;;  %s263_s1 = inlined_call_operand.hbm [shape: f32[16,32], index: 1, kind: input, shape index: {}]   ;;  %s264_s2 = inlined_call_operand.vmem [shape: f32[1,16], index: 2, kind: input, shape index: {}]   ;;  %s265_s3 = inlined_call_operand.hbm [shape: f32[8,32], index: 3, kind: output, shape index: {}]  }
   0x1   :  { %9 = vsyncpa [#allocation6], 0 }
   0x2   :  { %10 = vsyncpa [#allocation4], 0  ;;  %s16_s14 = sshll.u32 %s262_s0, 4  ;;  %s224_s15 = smov [#allocation2]   ;;  %s17_s14 = int_to_ptr.hbm [resolvable:$true] %s16_s14 }
   0x3   :  { %s18_s16 = sshll.u32 %s224_s15, 4  ;;  %s26_s19 = sshll.u32 %s263_s1, 4  ;;  %s19_s16 = int_to_ptr.vmem [resolvable:$true] %s18_s16  ;;  %s27_s19 = int_to_ptr.hbm [resolvable:$true] %s26_s19 }
   0x4   :  { %21 = dma.hbm_to_vmem [thread:$0]  %s17_s14, 128, %s19_s16, [#allocation3]  }
   0x5   :  { %s225_s20 = smov [#allocation5]   ;;  %s226_s22 = smov 128  }
   0x6   :  { %s28_s21 = sshll.u32 %s225_s20, 4  ;;  %s227_s23 = smov 8   ;;  %s29_s21 = int_to_ptr.vmem [resolvable:$true] %s28_s21 }
   0x7   :  { %34 = dma.hbm_to_vmem [thread:$0]  %s27_s19, 256, %s29_s21, [#allocation6], %s226_s22, %s226_s22, %s227_s23  }
   0x8   :  { %218 = dma.done.wait [#allocation3], 128  }
   0x9   :  { %219 = vsyncadd [#allocation3], 4294967168 }
   0xa   :  { %220 = dma.done.wait [#allocation6], 256  }
   0xb   :  { %221 = vsyncadd [#allocation6], 4294967040  ;;  %vm52_vm0 = vcmask 261120   ;;  %v47_v0 = vld [vmem:[#allocation5 + $0x8] sm:$0xff]  ;;  %v46_v1 = vld [vmem:[#allocation5] sm:$0xff]  ;;  %vm87_vm1 = vcmask 130048  }
   0xc   :  { %131 = vmatpush.xpose.msk.msra.mxu0 %vm52_vm0, %v47_v0  ;;  %v45_v2 = vld [vmem:[#allocation2] sm:$0xff]  ;;  %s229_s24 = smov [#allocation7]   ;;  %s120_s28 = sshll.u32 %s265_s3, 4  ;;  %vm111_vm6 = vcmask 261248   ;;  %s121_s28 = int_to_ptr.hbm [resolvable:$true] %s120_s28 }
   0xd   :  { %v141_v3 = vld [vmem:[%s264_s2] ss:$0 sm:$0xff]  ;;  %s228_s2 = smov 16   ;;  %s118_s25 = sshll.u32 %s229_s24, 4  ;;  %s119_s25 = int_to_ptr.vmem [resolvable:$true] %s118_s25 }
  0x10   :  { %132 = vmatpush.xpose.msk.msra.mxu0 %vm52_vm0, %v46_v1 }
  0x13   :  { %133 = vmatmul.msk.f32.vlgmr.msra.gmra.mxu0 %vm52_vm0, %v45_v2 }
  0x90   :  { %v79_v4 = vpop.f32.mrf.mxu0 }
  0x91   :  { %v80_v5 = vadd.f32 %v141_v3, %v79_v4 }
  0x93   :  { %v134_v6 = vclamps-f32 %v80_v5, 10.0 }
  0x95   :  { %v84_v7 = vmul.f32 1.442695, %v134_v6 }
  0x97   :  { %142 = vpow2.f32 %v84_v7 }
  0x9d   :  { %v143_v8 = vpop.eup %142 }
  0x9e   :  { %v86_v9 = vadd.f32 1.0, %v143_v8 }
  0xa0   :  { %v88_v10 = vsel %vm87_vm1, %v86_v9, 0.0  ;;  %106 = vst.msk [vmem:[#allocation7] sm:$0xff] %vm87_vm1, %v86_v9 }
  0xa1   :  { %89 = vadd.xlane.f32.xlu0 %v88_v10 }
 0x114   :  { %v90_v11 = vpop.xlane.xlu0 %89 }
 0x115   :  { %144 = vrcp.f32 %v90_v11  ;;  %v102_v15 = vand.u32 2147483648, %v90_v11  ;;  %v100_v17 = vand.u32 2147483647, %v90_v11  ;;  %vm96_vm3 = vweird.f32 %v90_v11 }
 0x117   :  { %v103_v19 = vor.u32 1.1754944e-38, %v102_v15  ;;  %vm101_vm5 = vcmp.eq.f32.partialorder %v100_v17, 8.507059e+37 }
 0x11b   :  { %v145_v12 = vpop.eup %144 }
 0x11c   :  { %v92_v13 = vmul.f32 %v145_v12, %v90_v11  ;;  %vm97_vm2 = vweird.f32 %v145_v12 }
 0x11d   :  { %vm98_vm4 = vmor %vm96_vm3, %vm97_vm2 }
 0x11e   :  { %v93_v14 = vsub.f32 1.0, %v92_v13 }
 0x120   :  { %v94_v16 = vmul.f32 %v145_v12, %v93_v14 }
 0x122   :  { %v95_v18 = vadd.f32 %v145_v12, %v94_v16 }
 0x124   :  { %v99_v20 = vsel %vm98_vm4, %v145_v12, %v95_v18 }
 0x125   :  { %v104_v21 = vsel %vm101_vm5, %v103_v19, %v99_v20 }
 0x126   :  { %v105_v22 = vmul.f32 %v104_v21, %v86_v9 }
 0x128   :  { %108 = vrot.lane.b32.xlu0 %v105_v22, %s228_s2 }
 0x19a   :  { %v109_v23 = vpop.permute.xlu0 %108 }
 0x19b   :  { %112 = vst.msk [vmem:[#allocation7] sm:$0xff] %vm111_vm6, %v109_v23 }
 0x19c   :  { %123 = dma.vmem_to_hbm [thread:$0]  %s119_s25, 128, %s121_s28, [#allocation4]  }
 0x19d   :  { %222 = dma.done.wait [#allocation4], 128  }
 0x19e   :  { %223 = vsyncadd [#allocation4], 4294967168 }
 0x19f   :  { %128 = vsyncpa [#allocation3], 1 }
 0x1a0   :  { %129 = vsyncpa [#allocation6], 1 }
 0x1a1   :  { %130 = vsyncpa [#allocation4], 1 }

</bundles_post_ra>
